<compile_context>
chip_gen: v5e
topology: v5e:2x2
jax: 0.10.0
libtpu: 0.0.40
codegen_flags: <defaults>
</compile_context>

<pallas_src>
import jax
import jax.numpy as jnp
from jax.experimental import pallas as pl
from jax.experimental.pallas import tpu as pltpu

_NCORES = 2                      # pass-1 partial-stats split (v7x has 2 TCs/chip)
_VMEM_LIMIT = 48 * 1024 * 1024   # safe on v7x (64 MiB physical), roomy on v5e/v6e


def _round_up(x, m):
    return (x + m - 1) // m * m


def _conv_relu_t(taps_ref, wconv_ref, bconv_ref):
    """relu(Conv1d(1, F, k=4, s=2, p=1)) on im2col taps, transposed layout.

    taps_ref: (4, TM) lane-major taps, wconv_ref: (F, 4), bconv_ref: (F, 1).
    Returns (F, TM) float32; every VPU op is lane-dense (TM on the lane axis).
    """
    t = taps_ref[...]                        # (4, TM)
    h = bconv_ref[...]                       # (F, 1), broadcasts over lanes
    for k in range(4):                       # 4 taps: (F,1)*(1,TM) FMAs on the VPU
        h = h + wconv_ref[:, k:k + 1] * t[k:k + 1, :]
    return jnp.maximum(h, 0.0)               # (F, TM)


def _stats_kernel(taps_ref, wconv_ref, bconv_ref, stats_ref):
    """Pass 1: per-channel sum / sum-of-squares of relu(conv(x)), per core."""
    @pl.when(pl.program_id(1) == 0)
    def _init():
        stats_ref[...] = jnp.zeros_like(stats_ref)

    h = _conv_relu_t(taps_ref, wconv_ref, bconv_ref)          # (F, TM)
    # Lane-axis reductions go to the XLU (has slack).  No per-tile padding
    # mask: zero-padded tap columns contribute exactly relu(b_conv) per row,
    # which the wrapper subtracts analytically.
    stats_ref[:, 0:1] += jnp.sum(h, axis=1, keepdims=True)
    stats_ref[:, 1:2] += jnp.sum(h * h, axis=1, keepdims=True)


def _logits_kernel(taps_ref, wconv_ref, bconv_ref, weff_ref, beff_ref, out_ref):
    """Pass 2: relu(conv(x)) @ (BN-folded FC weights) + bias, one (TM, V) tile."""
    h_t = _conv_relu_t(taps_ref, wconv_ref, bconv_ref)        # (F, TM) f32
    h = h_t.T.astype(jnp.bfloat16)                             # one XLU transpose -> MXU layout
    logits = jnp.dot(h, weff_ref[...], preferred_element_type=jnp.float32)
    out_ref[...] = (logits + beff_ref[...]).astype(out_ref.dtype)


def simple_ctc_forward(x, params, *, tile_rows=4096):
    """x: (B, T) float32.  Returns logits (B, T_out, vocab) in float32."""
    B, T = x.shape
    w_conv = params["w_conv"]      # (F, 1, 4)  PyTorch Conv1d weight layout
    b_conv = params["b_conv"]      # (F,)
    gamma = params["bn_gamma"]     # (F,)
    beta = params["bn_beta"]       # (F,)
    w_fc = params["w_fc"]          # (V, F)     PyTorch Linear weight layout
    b_fc = params["b_fc"]          # (V,)

    F_dim = w_conv.shape[0]
    V = w_fc.shape[0]
    T_out = (T + 2 * 1 - 4) // 2 + 1          # Conv1d(k=4, s=2, p=1) output len
    M = B * T_out

    # Row tile lives on the lane axis -> multiple of 128.
    TM = min(_round_up(tile_rows, 128), _round_up(M, 128))
    n_tiles_min = -(-M // TM)
    tiles_per_core = -(-n_tiles_min // _NCORES)
    n_tiles = _NCORES * tiles_per_core
    M_pad = n_tiles * TM

    # im2col taps, lane-major (4, M_pad): taps[k, b*T_out + t] = x_pad[b, 2*t+k].
    # Built with 4 strided slices (no XLA gather); padded columns are exactly 0.
    x_pad = jnp.pad(x.astype(jnp.float32), ((0, 0), (1, 1)))
    taps = jnp.stack(
        [x_pad[:, k::2][:, :T_out].reshape(M) for k in range(4)], axis=0)
    if M_pad != M:
        taps = jnp.pad(taps, ((0, 0), (0, M_pad - M)))

    wconv_2d = w_conv[:, 0, :].astype(jnp.float32)             # (F, 4)
    bconv_2d = b_conv.reshape(F_dim, 1).astype(jnp.float32)    # (F, 1)

    cparams_stats = pltpu.CompilerParams(
        dimension_semantics=("parallel", "arbitrary"),
        vmem_limit_bytes=_VMEM_LIMIT)
    cparams_logits = pltpu.CompilerParams(
        dimension_semantics=("parallel",),
        vmem_limit_bytes=_VMEM_LIMIT)

    # ---- Pass 1: per-core per-channel sum / sum-of-squares of relu(conv(x)).
    stats = pl.pallas_call(
        _stats_kernel,
        out_shape=jax.ShapeDtypeStruct((_NCORES, F_dim, 2), jnp.float32),
        grid=(_NCORES, tiles_per_core),
        in_specs=[
            pl.BlockSpec((4, TM), lambda c, i: (0, c * tiles_per_core + i)),
            pl.BlockSpec((F_dim, 4), lambda c, i: (0, 0)),
            pl.BlockSpec((F_dim, 1), lambda c, i: (0, 0)),
        ],
        out_specs=pl.BlockSpec((None, F_dim, 2), lambda c, i: (c, 0, 0)),
        compiler_params=cparams_stats,
        cost_estimate=pl.CostEstimate(
            flops=12 * M_pad * F_dim,
            transcendentals=0,
            bytes_accessed=4 * M_pad * 4 + (5 + 2 * _NCORES) * F_dim * 4),
    )(taps, wconv_2d, bconv_2d)

    # Combine per-core partials and remove the known contribution of the
    # (M_pad - M) zero tap rows: each contributes relu(b_conv) to the sum and
    # relu(b_conv)^2 to the sum of squares.
    stats_tot = jnp.sum(stats, axis=0)                          # (F, 2)
    rb = jnp.maximum(b_conv.astype(jnp.float32), 0.0)           # (F,)
    n_pad = float(M_pad - M)
    sum_h = stats_tot[:, 0] - n_pad * rb
    sumsq_h = stats_tot[:, 1] - n_pad * rb * rb

    # Fold training-mode BatchNorm1d (biased batch variance, eps=1e-5) into the
    # Linear layer:  logits = h @ (scale * W) + (shift @ W + b).
    # NOTE: single-pass E[h^2]-E[h]^2 variance in f32; fine at these tolerances.
    mean = sum_h / M
    var = jnp.maximum(sumsq_h / M - mean * mean, 0.0)
    scale = gamma.astype(jnp.float32) * jax.lax.rsqrt(var + 1e-5)
    shift = beta.astype(jnp.float32) - mean * scale
    wfc_2d = jnp.transpose(w_fc, (1, 0)).astype(jnp.float32)              # (F, V)
    w_eff = (wfc_2d * scale[:, None]).astype(jnp.bfloat16)                # (F, V)
    b_eff = (shift @ wfc_2d + b_fc.astype(jnp.float32)).reshape(1, V)     # (1, V)

    # ---- Pass 2: recompute conv+ReLU per tile, folded BN + Linear on the MXU.
    logits_flat = pl.pallas_call(
        _logits_kernel,
        out_shape=jax.ShapeDtypeStruct((M_pad, V), jnp.float32),
        grid=(n_tiles,),
        in_specs=[
            pl.BlockSpec((4, TM), lambda i: (0, i)),
            pl.BlockSpec((F_dim, 4), lambda i: (0, 0)),
            pl.BlockSpec((F_dim, 1), lambda i: (0, 0)),
            pl.BlockSpec((F_dim, V), lambda i: (0, 0)),
            pl.BlockSpec((1, V), lambda i: (0, 0)),
        ],
        out_specs=pl.BlockSpec((TM, V), lambda i: (i, 0)),
        compiler_params=cparams_logits,
        cost_estimate=pl.CostEstimate(
            flops=2 * M_pad * F_dim * (4 + V),
            transcendentals=0,
            bytes_accessed=4 * M_pad * 4 + M_pad * V * 4
                           + (5 * F_dim + F_dim * V + V) * 4),
    )(taps, wconv_2d, bconv_2d, w_eff, b_eff)

    if M_pad != M:
        logits_flat = logits_flat[:M]
    return logits_flat.reshape(B, T_out, V)


def init_params(key, vocab_size=32, feature_dim=64):
    """Deterministic synthetic parameters matching the module's shapes."""
    k1, k2, k3, k4 = jax.random.split(key, 4)
    bound_c = 1.0 / jnp.sqrt(4.0)                 # Conv1d fan_in = 1*4
    w_conv = jax.random.uniform(k1, (feature_dim, 1, 4), jnp.float32,
                                -bound_c, bound_c)
    b_conv = jax.random.uniform(k2, (feature_dim,), jnp.float32,
                                -bound_c, bound_c)
    bn_gamma = jnp.ones((feature_dim,), jnp.float32)
    bn_beta = jnp.zeros((feature_dim,), jnp.float32)
    bound_l = 1.0 / jnp.sqrt(float(feature_dim))  # Linear fan_in = F
    w_fc = jax.random.uniform(k3, (vocab_size, feature_dim), jnp.float32,
                              -bound_l, bound_l)
    b_fc = jax.random.uniform(k4, (vocab_size,), jnp.float32,
                              -bound_l, bound_l)
    return {"w_conv": w_conv, "b_conv": b_conv,
            "bn_gamma": bn_gamma, "bn_beta": bn_beta,
            "w_fc": w_fc, "b_fc": b_fc}


def _reference_forward(x, params):
    """Pure-JAX f32 reference of the same forward pass (sanity check)."""
    B, T = x.shape
    T_out = (T + 2 - 4) // 2 + 1
    x_pad = jnp.pad(x, ((0, 0), (1, 1)))
    idx = 2 * jnp.arange(T_out)[:, None] + jnp.arange(4)[None, :]
    patches = x_pad[:, idx].reshape(B * T_out, 4)
    h = patches @ params["w_conv"][:, 0, :].T + params["b_conv"][None, :]
    h = jnp.maximum(h, 0.0)
    mean = jnp.mean(h, axis=0, keepdims=True)
    var = jnp.mean((h - mean) ** 2, axis=0, keepdims=True)
    h = (h - mean) / jnp.sqrt(var + 1e-5) * params["bn_gamma"] + params["bn_beta"]
    logits = h @ params["w_fc"].T + params["b_fc"][None, :]
    return logits.reshape(B, T_out, -1)


if __name__ == "__main__":
    key = jax.random.PRNGKey(0)
    k_param, k_x = jax.random.split(key)

    B, T = 2, 16
    vocab_size, feature_dim = 32, 64

    params = init_params(k_param, vocab_size=vocab_size, feature_dim=feature_dim)
    x = jax.random.normal(k_x, (B, T), dtype=jnp.float32)

    fwd = jax.jit(simple_ctc_forward)
    logits = jax.block_until_ready(fwd(x, params))

    ref = _reference_forward(x, params)
    assert logits.shape == (B, T // 2, vocab_size)
    # bf16 MXU operands (f32 accumulation) -> tolerance relaxed vs pure f32.
    assert jnp.allclose(logits, ref, atol=3e-2, rtol=3e-2), (
        float(jnp.max(jnp.abs(logits - ref))))

    print("KERNEL_OK")
</pallas_src>

<mosaic_0001>
module attributes {stable_mosaic.version = 11 : i64} {
  func.func @_stats_kernel(%arg0: i32, %arg1: i32, %arg2: memref<4x128xf32, #tpu.memory_space<vmem>>, %arg3: memref<64x4xf32, #tpu.memory_space<vmem>>, %arg4: memref<64x1xf32, #tpu.memory_space<vmem>>, %arg5: memref<1x64x2xf32, #tpu.memory_space<vmem>>) attributes {dimension_semantics = [#tpu.dimension_semantics<parallel>, #tpu.dimension_semantics<arbitrary>], iteration_bounds = array<i64: 2, 1>, scalar_prefetch = 0 : i64, scratch_operands = 0 : i64, tpu.core_type = #tpu.core_type<tc>, window_params = [{transform_indices = @transform_0, window_bounds = array<i64: 4, 128>}, {pipeline_mode = #tpu.pipeline_mode<synchronous>, transform_indices = @transform_1, window_bounds = array<i64: 64, 4>}, {pipeline_mode = #tpu.pipeline_mode<synchronous>, transform_indices = @transform_2, window_bounds = array<i64: 64, 1>}, {transform_indices = @transform_3, window_bounds = array<i64: 1, 64, 2>}]} {
    %c0_i32 = arith.constant 0 : i32
    %0 = arith.cmpi eq, %arg1, %c0_i32 : i32
    %1 = arith.extui %0 : i1 to i32
    %c0_i32_0 = arith.constant 0 : i32
    %2 = arith.cmpi ne, %1, %c0_i32_0 : i32
    scf.if %2 {
      %cst_23 = arith.constant 0.000000e+00 : f32
      %49 = vector.broadcast %cst_23 : f32 to vector<64x2xf32>
      %c0_24 = arith.constant 0 : index
      %c0_25 = arith.constant 0 : index
      %c0_26 = arith.constant 0 : index
      %50 = vector.load %arg5[%c0_24, %c0_25, %c0_26] : memref<1x64x2xf32, #tpu.memory_space<vmem>>, vector<1x64x2xf32>
      %51 = vector.shape_cast %50 : vector<1x64x2xf32> to vector<64x2xf32>
      %52 = vector.shape_cast %49 : vector<64x2xf32> to vector<1x64x2xf32>
      tpu.vector_store %arg5[%c0_24, %c0_25, %c0_26], %52 {strides = array<i32>} : memref<1x64x2xf32, #tpu.memory_space<vmem>>, vector<1x64x2xf32>,
    } else {
    }
    %c0 = arith.constant 0 : index
    %c0_1 = arith.constant 0 : index
    %3 = vector.load %arg2[%c0, %c0_1] : memref<4x128xf32, #tpu.memory_space<vmem>>, vector<4x128xf32>
    %c0_2 = arith.constant 0 : index
    %c0_3 = arith.constant 0 : index
    %4 = vector.load %arg4[%c0_2, %c0_3] : memref<64x1xf32, #tpu.memory_space<vmem>>, vector<64x1xf32>
    %c0_4 = arith.constant 0 : index
    %c0_5 = arith.constant 0 : index
    %5 = vector.load %arg3[%c0_4, %c0_5] : memref<64x4xf32, #tpu.memory_space<vmem>>, vector<64x1xf32>
    %6 = vector.extract_strided_slice %3 {offsets = [0, 0], sizes = [1, 128], strides = [1, 1]} : vector<4x128xf32> to vector<1x128xf32>
    %7 = vector.broadcast %5 : vector<64x1xf32> to vector<64x128xf32>
    %8 = vector.broadcast %6 : vector<1x128xf32> to vector<64x128xf32>
    %9 = arith.mulf %7, %8 : vector<64x128xf32>
    %10 = vector.broadcast %4 : vector<64x1xf32> to vector<64x128xf32>
    %11 = arith.addf %10, %9 : vector<64x128xf32>
    %c0_6 = arith.constant 0 : index
    %c1 = arith.constant 1 : index
    %12 = vector.load %arg3[%c0_6, %c1] : memref<64x4xf32, #tpu.memory_space<vmem>>, vector<64x1xf32>
    %13 = vector.extract_strided_slice %3 {offsets = [1, 0], sizes = [1, 128], strides = [1, 1]} : vector<4x128xf32> to vector<1x128xf32>
    %14 = vector.broadcast %12 : vector<64x1xf32> to vector<64x128xf32>
    %15 = vector.broadcast %13 : vector<1x128xf32> to vector<64x128xf32>
    %16 = arith.mulf %14, %15 : vector<64x128xf32>
    %17 = arith.addf %11, %16 : vector<64x128xf32>
    %c0_7 = arith.constant 0 : index
    %c2 = arith.constant 2 : index
    %18 = vector.load %arg3[%c0_7, %c2] : memref<64x4xf32, #tpu.memory_space<vmem>>, vector<64x1xf32>
    %19 = vector.extract_strided_slice %3 {offsets = [2, 0], sizes = [1, 128], strides = [1, 1]} : vector<4x128xf32> to vector<1x128xf32>
    %20 = vector.broadcast %18 : vector<64x1xf32> to vector<64x128xf32>
    %21 = vector.broadcast %19 : vector<1x128xf32> to vector<64x128xf32>
    %22 = arith.mulf %20, %21 : vector<64x128xf32>
    %23 = arith.addf %17, %22 : vector<64x128xf32>
    %c0_8 = arith.constant 0 : index
    %c3 = arith.constant 3 : index
    %24 = vector.load %arg3[%c0_8, %c3] : memref<64x4xf32, #tpu.memory_space<vmem>>, vector<64x1xf32>
    %25 = vector.extract_strided_slice %3 {offsets = [3, 0], sizes = [1, 128], strides = [1, 1]} : vector<4x128xf32> to vector<1x128xf32>
    %26 = vector.broadcast %24 : vector<64x1xf32> to vector<64x128xf32>
    %27 = vector.broadcast %25 : vector<1x128xf32> to vector<64x128xf32>
    %28 = arith.mulf %26, %27 : vector<64x128xf32>
    %29 = arith.addf %23, %28 : vector<64x128xf32>
    %cst = arith.constant 0.000000e+00 : f32
    %30 = vector.broadcast %cst : f32 to vector<64x128xf32>
    %31 = arith.maximumf %29, %30 : vector<64x128xf32>
    %c0_9 = arith.constant 0 : index
    %c0_10 = arith.constant 0 : index
    %c0_11 = arith.constant 0 : index
    %32 = vector.load %arg5[%c0_9, %c0_10, %c0_11] : memref<1x64x2xf32, #tpu.memory_space<vmem>>, vector<1x64x1xf32>
    %33 = vector.shape_cast %32 : vector<1x64x1xf32> to vector<64x1xf32>
    %cst_12 = arith.constant dense<0.000000e+00> : vector<64xf32>
    %34 = vector.multi_reduction <add>, %31, %cst_12 [1] : vector<64x128xf32> to vector<64xf32>
    %35 = vector.shape_cast %34 : vector<64xf32> to vector<64x1xf32>
    %36 = arith.addf %33, %35 : vector<64x1xf32>
    %c0_13 = arith.constant 0 : index
    %c0_14 = arith.constant 0 : index
    %c0_15 = arith.constant 0 : index
    %37 = vector.load %arg5[%c0_13, %c0_14, %c0_15] : memref<1x64x2xf32, #tpu.memory_space<vmem>>, vector<1x64x1xf32>
    %38 = vector.shape_cast %37 : vector<1x64x1xf32> to vector<64x1xf32>
    %39 = vector.shape_cast %36 : vector<64x1xf32> to vector<1x64x1xf32>
    tpu.vector_store %arg5[%c0_13, %c0_14, %c0_15], %39 {strides = array<i32>} : memref<1x64x2xf32, #tpu.memory_space<vmem>>, vector<1x64x1xf32>,
    %c0_16 = arith.constant 0 : index
    %c0_17 = arith.constant 0 : index
    %c1_18 = arith.constant 1 : index
    %40 = vector.load %arg5[%c0_16, %c0_17, %c1_18] : memref<1x64x2xf32, #tpu.memory_space<vmem>>, vector<1x64x1xf32>
    %41 = vector.shape_cast %40 : vector<1x64x1xf32> to vector<64x1xf32>
    %42 = arith.mulf %31, %31 : vector<64x128xf32>
    %cst_19 = arith.constant dense<0.000000e+00> : vector<64xf32>
    %43 = vector.multi_reduction <add>, %42, %cst_19 [1] : vector<64x128xf32> to vector<64xf32>
    %44 = vector.shape_cast %43 : vector<64xf32> to vector<64x1xf32>
    %45 = arith.addf %41, %44 : vector<64x1xf32>
    %c0_20 = arith.constant 0 : index
    %c0_21 = arith.constant 0 : index
    %c1_22 = arith.constant 1 : index
    %46 = vector.load %arg5[%c0_20, %c0_21, %c1_22] : memref<1x64x2xf32, #tpu.memory_space<vmem>>, vector<1x64x1xf32>
    %47 = vector.shape_cast %46 : vector<1x64x1xf32> to vector<64x1xf32>
    %48 = vector.shape_cast %45 : vector<64x1xf32> to vector<1x64x1xf32>
    tpu.vector_store %arg5[%c0_20, %c0_21, %c1_22], %48 {strides = array<i32>} : memref<1x64x2xf32, #tpu.memory_space<vmem>>, vector<1x64x1xf32>,
    return
  }
  func.func @transform_0(%arg0: i32, %arg1: i32) -> (i32, i32) {
    %c1_i32 = arith.constant 1 : i32
    %0 = arith.muli %arg0, %c1_i32 : i32
    %1 = arith.addi %0, %arg1 : i32
    %c0_i32 = arith.constant 0 : i32
    %c0_i32_0 = arith.constant 0 : i32
    return %c0_i32, %1 : i32, i32
  }
  func.func @transform_1(%arg0: i32, %arg1: i32) -> (i32, i32) {
    %c0_i32 = arith.constant 0 : i32
    %c0_i32_0 = arith.constant 0 : i32
    %c0_i32_1 = arith.constant 0 : i32
    return %c0_i32, %c0_i32_0 : i32, i32
  }
  func.func @transform_2(%arg0: i32, %arg1: i32) -> (i32, i32) {
    %c0_i32 = arith.constant 0 : i32
    %c0_i32_0 = arith.constant 0 : i32
    %c0_i32_1 = arith.constant 0 : i32
    return %c0_i32, %c0_i32_0 : i32, i32
  }
  func.func @transform_3(%arg0: i32, %arg1: i32) -> (i32, i32, i32) {
    %c0_i32 = arith.constant 0 : i32
    %c0_i32_0 = arith.constant 0 : i32
    %c0_i32_1 = arith.constant 0 : i32
    return %arg0, %c0_i32, %c0_i32_0 : i32, i32, i32
  }
}

module attributes {stable_mosaic.version = 11 : i64} {
  func.func @_logits_kernel(%arg0: i32, %arg1: memref<4x128xf32, #tpu.memory_space<vmem>>, %arg2: memref<64x4xf32, #tpu.memory_space<vmem>>, %arg3: memref<64x1xf32, #tpu.memory_space<vmem>>, %arg4: memref<64x32xbf16, #tpu.memory_space<vmem>>, %arg5: memref<1x32xf32, #tpu.memory_space<vmem>>, %arg6: memref<128x32xf32, #tpu.memory_space<vmem>>) attributes {dimension_semantics = [#tpu.dimension_semantics<parallel>], iteration_bounds = array<i64: 2>, scalar_prefetch = 0 : i64, scratch_operands = 0 : i64, tpu.core_type = #tpu.core_type<tc>, window_params = [{transform_indices = @transform_0, window_bounds = array<i64: 4, 128>}, {pipeline_mode = #tpu.pipeline_mode<synchronous>, transform_indices = @transform_1, window_bounds = array<i64: 64, 4>}, {pipeline_mode = #tpu.pipeline_mode<synchronous>, transform_indices = @transform_2, window_bounds = array<i64: 64, 1>}, {pipeline_mode = #tpu.pipeline_mode<synchronous>, transform_indices = @transform_3, window_bounds = array<i64: 64, 32>}, {pipeline_mode = #tpu.pipeline_mode<synchronous>, transform_indices = @transform_4, window_bounds = array<i64: 1, 32>}, {transform_indices = @transform_5, window_bounds = array<i64: 128, 32>}]} {
    %c0 = arith.constant 0 : index
    %c0_0 = arith.constant 0 : index
    %0 = vector.load %arg1[%c0, %c0_0] : memref<4x128xf32, #tpu.memory_space<vmem>>, vector<4x128xf32>
    %c0_1 = arith.constant 0 : index
    %c0_2 = arith.constant 0 : index
    %1 = vector.load %arg3[%c0_1, %c0_2] : memref<64x1xf32, #tpu.memory_space<vmem>>, vector<64x1xf32>
    %c0_3 = arith.constant 0 : index
    %c0_4 = arith.constant 0 : index
    %2 = vector.load %arg2[%c0_3, %c0_4] : memref<64x4xf32, #tpu.memory_space<vmem>>, vector<64x1xf32>
    %3 = vector.extract_strided_slice %0 {offsets = [0, 0], sizes = [1, 128], strides = [1, 1]} : vector<4x128xf32> to vector<1x128xf32>
    %4 = vector.broadcast %2 : vector<64x1xf32> to vector<64x128xf32>
    %5 = vector.broadcast %3 : vector<1x128xf32> to vector<64x128xf32>
    %6 = arith.mulf %4, %5 : vector<64x128xf32>
    %7 = vector.broadcast %1 : vector<64x1xf32> to vector<64x128xf32>
    %8 = arith.addf %7, %6 : vector<64x128xf32>
    %c0_5 = arith.constant 0 : index
    %c1 = arith.constant 1 : index
    %9 = vector.load %arg2[%c0_5, %c1] : memref<64x4xf32, #tpu.memory_space<vmem>>, vector<64x1xf32>
    %10 = vector.extract_strided_slice %0 {offsets = [1, 0], sizes = [1, 128], strides = [1, 1]} : vector<4x128xf32> to vector<1x128xf32>
    %11 = vector.broadcast %9 : vector<64x1xf32> to vector<64x128xf32>
    %12 = vector.broadcast %10 : vector<1x128xf32> to vector<64x128xf32>
    %13 = arith.mulf %11, %12 : vector<64x128xf32>
    %14 = arith.addf %8, %13 : vector<64x128xf32>
    %c0_6 = arith.constant 0 : index
    %c2 = arith.constant 2 : index
    %15 = vector.load %arg2[%c0_6, %c2] : memref<64x4xf32, #tpu.memory_space<vmem>>, vector<64x1xf32>
    %16 = vector.extract_strided_slice %0 {offsets = [2, 0], sizes = [1, 128], strides = [1, 1]} : vector<4x128xf32> to vector<1x128xf32>
    %17 = vector.broadcast %15 : vector<64x1xf32> to vector<64x128xf32>
    %18 = vector.broadcast %16 : vector<1x128xf32> to vector<64x128xf32>
    %19 = arith.mulf %17, %18 : vector<64x128xf32>
    %20 = arith.addf %14, %19 : vector<64x128xf32>
    %c0_7 = arith.constant 0 : index
    %c3 = arith.constant 3 : index
    %21 = vector.load %arg2[%c0_7, %c3] : memref<64x4xf32, #tpu.memory_space<vmem>>, vector<64x1xf32>
    %22 = vector.extract_strided_slice %0 {offsets = [3, 0], sizes = [1, 128], strides = [1, 1]} : vector<4x128xf32> to vector<1x128xf32>
    %23 = vector.broadcast %21 : vector<64x1xf32> to vector<64x128xf32>
    %24 = vector.broadcast %22 : vector<1x128xf32> to vector<64x128xf32>
    %25 = arith.mulf %23, %24 : vector<64x128xf32>
    %26 = arith.addf %20, %25 : vector<64x128xf32>
    %cst = arith.constant 0.000000e+00 : f32
    %27 = vector.broadcast %cst : f32 to vector<64x128xf32>
    %28 = arith.maximumf %26, %27 : vector<64x128xf32>
    %29 = tpu.transpose %28, [1, 0] : vector<64x128xf32> -> vector<128x64xf32>
    %30 = arith.truncf %29 : vector<128x64xf32> to vector<128x64xbf16>
    %c0_8 = arith.constant 0 : index
    %c0_9 = arith.constant 0 : index
    %31 = vector.load %arg4[%c0_8, %c0_9] : memref<64x32xbf16, #tpu.memory_space<vmem>>, vector<64x32xbf16>
    %cst_10 = arith.constant dense<0.000000e+00> : vector<128x32xf32>
    %32 = tpu.matmul %30, %31, %cst_10 {dimension_numbers = #tpu.dot_dimension_numbers<[1], [0], [0], [1], [0, 0, 1, 1], [], []>} : vector<128x64xbf16>, vector<64x32xbf16>, vector<128x32xf32> -> vector<128x32xf32>
    %c0_11 = arith.constant 0 : index
    %c0_12 = arith.constant 0 : index
    %33 = vector.load %arg5[%c0_11, %c0_12] : memref<1x32xf32, #tpu.memory_space<vmem>>, vector<1x32xf32>
    %34 = vector.broadcast %33 : vector<1x32xf32> to vector<128x32xf32>
    %35 = arith.addf %32, %34 : vector<128x32xf32>
    %c0_13 = arith.constant 0 : index
    %c0_14 = arith.constant 0 : index
    %36 = vector.load %arg6[%c0_13, %c0_14] : memref<128x32xf32, #tpu.memory_space<vmem>>, vector<128x32xf32>
    tpu.vector_store %arg6[%c0_13, %c0_14], %35 {strides = array<i32>} : memref<128x32xf32, #tpu.memory_space<vmem>>, vector<128x32xf32>,
    return
  }
  func.func @transform_0(%arg0: i32) -> (i32, i32) {
    %c0_i32 = arith.constant 0 : i32
    %c0_i32_0 = arith.constant 0 : i32
    return %c0_i32, %arg0 : i32, i32
  }
  func.func @transform_1(%arg0: i32) -> (i32, i32) {
    %c0_i32 = arith.constant 0 : i32
    %c0_i32_0 = arith.constant 0 : i32
    %c0_i32_1 = arith.constant 0 : i32
    return %c0_i32, %c0_i32_0 : i32, i32
  }
  func.func @transform_2(%arg0: i32) -> (i32, i32) {
    %c0_i32 = arith.constant 0 : i32
    %c0_i32_0 = arith.constant 0 : i32
    %c0_i32_1 = arith.constant 0 : i32
    return %c0_i32, %c0_i32_0 : i32, i32
  }
  func.func @transform_3(%arg0: i32) -> (i32, i32) {
    %c0_i32 = arith.constant 0 : i32
    %c0_i32_0 = arith.constant 0 : i32
    %c0_i32_1 = arith.constant 0 : i32
    return %c0_i32, %c0_i32_0 : i32, i32
  }
  func.func @transform_4(%arg0: i32) -> (i32, i32) {
    %c0_i32 = arith.constant 0 : i32
    %c0_i32_0 = arith.constant 0 : i32
    %c0_i32_1 = arith.constant 0 : i32
    return %c0_i32, %c0_i32_0 : i32, i32
  }
  func.func @transform_5(%arg0: i32) -> (i32, i32) {
    %c0_i32 = arith.constant 0 : i32
    %c0_i32_0 = arith.constant 0 : i32
    return %arg0, %c0_i32 : i32, i32
  }
}

</mosaic_0001>

<bundles_post_ra>
// kernel: simple_ctc_forward.2
= control target key start
LH: loop header
LB: loop body
LE: loop exit
PB: predicated region body
PF: predicated region fallthrough
CT: control target
= control target key end

     0   :  { %s723_s12 = smov 0   ;;  %s725_s13 = smov 0   ;;  %s959_s0 = inlined_call_operand.vmem [shape: f32[4,256], index: 0, kind: input, shape index: {}]   ;;  %s960_s1 = inlined_call_operand.vmem [shape: f32[64,4], index: 1, kind: input, shape index: {}]   ;;  %s961_s2 = inlined_call_operand.vmem [shape: f32[64,1], index: 2, kind: input, shape index: {}]   ;;  %s962_s3 = inlined_call_operand.vmem [shape: f32[2,64,2], index: 3, kind: output, shape index: {}]  }
   0x1   :  { %s727_s14 = smov 0  }
   0x2 LB: > { %s25_s15 = sadd.s32 1, %s692_s13  ;;  %p626_p0 = scmp.ge.s32.totalorder %s696_s14, 1  ;;  %s696_s14 = sphi %s727_s14, %s13_s14   ;;  %s692_s13 = sphi %s725_s13, %s964_s13   ;;  %s688_s12 = sphi %s723_s12, %s963_s12  }
   0x3   : > { %p27_p1 = scmp.ge.s32.totalorder %s25_s15, 2  ;;  %p152_p2 = scmp.lt.s32.totalorder %s696_s14, 3 }
   0x5   : > { %s966_s15 = smov (%p27_p1, %s25_s15), 0  ;;  %p153_p3 = pnand %p626_p0, %p152_p2 }
   0x6   : > { %p177_p4 = scmp.lt.s32.totalorder (!%p153_p3), %s688_s12, 1 }
   0x7   : > { %156 = sbr.rel (%p153_p3) target bundleno = 386 (0x182), region = 32 }
   0xc   : > { %v746_v0 = vld [vmem:[%s960_s1 + $0x20] sm:$0xff]  ;;  %v211_v1 = vld [vmem:[%s960_s1 + $0x10] sm:$0xff]  ;;  %v698_v3 = vmov 0   ;;  %v761_v4 = vld [vmem:[%s960_s1 + $0x28] sm:$0xff]  ;;  %v699_v17 = vmov 1   ;;  %v700_v18 = vmov 2  }
   0xd   : > { %v754_v2 = vld [vmem:[%s960_s1] sm:$0xff]  ;;  %664 = vset.pattern.permute.xlu2 %v698_v3  ;;  %663 = vset.pattern.permute.xlu1 %v698_v3  ;;  %v212_v5 = vld [vmem:[%s960_s1 + $0x18] sm:$0xff]  ;;  %v210_v6 = vld [vmem:[%s960_s1 + $0x8] sm:$0xff]  ;;  %v701_v19 = vmov 3   ;;  %s968_s12 = smov (!%p177_p4, %s688_s12), 1  ;;  %vm191_vm0 = vcmask 15360  }
   0xe   : > { %662 = vset.pattern.permute.xlu0 %v698_v3  ;;  %239 = vperm.xlu2 %664, %v746_v0   ;;  %v201_v7 = vld [vmem:[%s961_s2] sm:$0xff]  ;;  %v216_v8 = vld [vmem:[%s960_s1 + $0x38] sm:$0xff]  ;;  %v215_v9 = vld [vmem:[%s960_s1 + $0x30] sm:$0xff]  ;;  %s627_s25 = sshll.u32 %s968_s12, 2  ;;  %s632_s29 = sshll.u32 %s968_s12, 6  ;;  %vm501_vm1 = vcmask 7168  }
   0xf   : > { %229 = vperm.xlu1 %663, %v211_v1   ;;  %219 = vperm.xlu0 %662, %v754_v2   ;;  %v204_v10 = vld [vmem:[%s961_s2 + $0x18] sm:$0xff]  ;;  %v203_v11 = vld [vmem:[%s961_s2 + $0x10] sm:$0xff]  ;;  %v202_v12 = vld [vmem:[%s961_s2 + $0x8] sm:$0xff]  ;;  %s180_s28 = scalar_lea.vmem %s959_s0, %s627_s25  ;;  %s878_s5 = scalar_lea.vmem %s962_s3, %s632_s29  ;;  %vm550_vm2 = vcmask 15368  }
  0x10   : > { %v207_v13 = vld [vmem:[%s961_s2 + $0x30] sm:$0xff]  ;;  %v206_v14 = vld [vmem:[%s961_s2 + $0x28] sm:$0xff]  ;;  %v205_v15 = vld [vmem:[%s961_s2 + $0x20] sm:$0xff] }
  0x11   : > { %v208_v16 = vld [vmem:[%s961_s2 + $0x38] sm:$0xff]  ;;  %v200_v23 = vld [vmem:[%s180_s28] sm:$0xf] }
  0x12   : > { %v817_v24 = vperm.slane %v200_v23, 0  ;;  %v828_v43 = vperm.slane %v200_v23, 1  ;;  %v840_v63 = vperm.slane %v200_v23, 2  ;;  %v844_v3 = vperm.slane %v200_v23, 3 }
  0x16   : > { %244 = vperm.xlu2 %664, %v761_v4  }
  0x17   : > { %234 = vperm.xlu1 %663, %v212_v5   ;;  %224 = vperm.xlu0 %662, %v210_v6  }
  0x1e   : > { %268 = vperm.xlu2 %664, %v201_v7  }
  0x1f   : > { %254 = vperm.xlu1 %663, %v216_v8   ;;  %249 = vperm.xlu0 %662, %v215_v9  }
  0x26   : > { %283 = vperm.xlu2 %664, %v204_v10  }
  0x27   : > { %278 = vperm.xlu1 %663, %v203_v11   ;;  %273 = vperm.xlu0 %662, %v202_v12  }
  0x2e   : > { %298 = vperm.xlu2 %664, %v207_v13  }
  0x2f   : > { %293 = vperm.xlu1 %663, %v206_v14   ;;  %288 = vperm.xlu0 %662, %v205_v15  }
  0x36   : > { %666 = vset.pattern.permute.xlu2 %v699_v17 }
  0x37   : > { %665 = vset.pattern.permute.xlu1 %v699_v17  ;;  %303 = vperm.xlu0 %662, %v208_v16  }
  0x38   : > { %315 = vperm.xlu1 %665, %v754_v2   ;;  %319 = vperm.xlu2 %666, %v210_v6  }
  0x3f   : > { %667 = vset.pattern.permute.xlu0 %v699_v17 }
  0x40   : > { %327 = vperm.xlu1 %665, %v212_v5   ;;  %323 = vperm.xlu0 %667, %v211_v1  }
  0x41   : > { %331 = vperm.xlu2 %666, %v746_v0  }
  0x48   : > { %335 = vperm.xlu1 %665, %v761_v4   ;;  %343 = vperm.xlu0 %667, %v216_v8  }
  0x49   : > { %339 = vperm.xlu2 %666, %v215_v9  }
  0x50   : > { %668 = vset.pattern.permute.xlu1 %v700_v18  ;;  %670 = vset.pattern.permute.xlu0 %v700_v18 }
  0x51   : > { %669 = vset.pattern.permute.xlu2 %v700_v18  ;;  %364 = vperm.xlu1 %668, %v754_v2  }
  0x52   : > { %372 = vperm.xlu0 %670, %v211_v1   ;;  %368 = vperm.xlu2 %669, %v210_v6  }
  0x59   : > { %376 = vperm.xlu1 %668, %v212_v5  }
  0x5a   : > { %392 = vperm.xlu0 %670, %v216_v8   ;;  %380 = vperm.xlu2 %669, %v746_v0  }
  0x61   : > { %384 = vperm.xlu1 %668, %v761_v4  }
  0x62   : > { %673 = vset.pattern.permute.xlu0 %v701_v19  ;;  %388 = vperm.xlu2 %669, %v215_v9  }
  0x63   : > { %421 = vperm.xlu0 %673, %v211_v1  }
  0x68   : > { %v240_v20 = vpop.permute.xlu2 %239 }
  0x69   : > { %671 = vset.pattern.permute.xlu1 %v701_v19  ;;  %v262_v44 = vmul.f32 %v817_v24, %v240_v20 }
  0x6a   : > { %672 = vset.pattern.permute.xlu2 %v701_v19  ;;  %413 = vperm.xlu1 %671, %v754_v2  }
  0x6b   : > { %441 = vperm.xlu0 %673, %v216_v8   ;;  %417 = vperm.xlu2 %672, %v210_v6  }
  0x70   : > { %v245_v21 = vpop.permute.xlu2 %244 }
  0x71   : > { %v263_v45 = vmul.f32 %v817_v24, %v245_v21 }
  0x72   : > { %425 = vperm.xlu1 %671, %v212_v5  }
  0x73   : > { %429 = vperm.xlu2 %672, %v746_v0  }
  0x78   : > { %v269_v22 = vpop.permute.xlu2 %268 }
  0x7a   : > { %433 = vperm.xlu1 %671, %v761_v4  }
  0x7b   : > { %437 = vperm.xlu2 %672, %v215_v9  }
  0x80   : > { %v284_v25 = vpop.permute.xlu2 %283 }
  0x81   : > { %v230_v26 = vpop.permute.xlu1 %229  ;;  %v220_v27 = vpop.permute.xlu0 %219 }
  0x82   : > { %v258_v28 = vmul.f32 %v817_v24, %v220_v27  ;;  %v260_v15 = vmul.f32 %v817_v24, %v230_v26 }
  0x84   : > { %v820_v29 = vadd.f32 %v269_v22, %v258_v28 }
  0x88   : > { %v299_v30 = vpop.permute.xlu2 %298 }
  0x89   : > { %v235_v31 = vpop.permute.xlu1 %234  ;;  %v225_v32 = vpop.permute.xlu0 %224 }
  0x8a   : > { %v261_v33 = vmul.f32 %v817_v24, %v235_v31  ;;  %v259_v62 = vmul.f32 %v817_v24, %v225_v32 }
  0x8c   : > { %v823_v34 = vadd.f32 %v284_v25, %v261_v33 }
  0x91   : > { %v825_v35 = vpop.permute.xlu1 %254  ;;  %v250_v36 = vpop.permute.xlu0 %249 }
  0x92   : > { %v264_v37 = vmul.f32 %v817_v24, %v250_v36  ;;  %v320_v38 = vpop.permute.xlu2 %319 }
  0x93   : > { %v348_v0 = vmul.f32 %v828_v43, %v320_v38 }
  0x94   : > { %v312_v39 = vadd.f32 %v299_v30, %v264_v37 }
  0x99   : > { %v279_v40 = vpop.permute.xlu1 %278  ;;  %v274_v41 = vpop.permute.xlu0 %273 }
  0x9a   : > { %v307_v1 = vadd.f32 %v274_v41, %v259_v62  ;;  %v308_v17 = vadd.f32 %v279_v40, %v260_v15 }
  0x9b   : > { %v332_v42 = vpop.permute.xlu2 %331 }
  0x9c   : > { %v351_v46 = vmul.f32 %v828_v43, %v332_v42  ;;  %v356_v5 = vadd.f32 %v348_v0, %v307_v1 }
  0xa1   : > { %v294_v47 = vpop.permute.xlu1 %293  ;;  %v289_v48 = vpop.permute.xlu0 %288 }
  0xa2   : > { %v833_v49 = vadd.f32 %v294_v47, %v263_v45  ;;  %v310_v50 = vadd.f32 %v289_v48, %v262_v44 }
  0xa3   : > { %v340_v51 = vpop.permute.xlu2 %339 }
  0xa4   : > { %v359_v52 = vadd.f32 %v351_v46, %v310_v50  ;;  %v353_v22 = vmul.f32 %v828_v43, %v340_v51 }
  0xa6   : > { %v361_v32 = vadd.f32 %v353_v22, %v312_v39 }
  0xa9   : > { %v835_v53 = vpop.permute.xlu0 %303 }
  0xaa   : > { %v316_v54 = vpop.permute.xlu1 %315 }
  0xab   : > { %v347_v27 = vmul.f32 %v828_v43, %v316_v54 }
  0xac   : > { %v369_v55 = vpop.permute.xlu2 %368 }
  0xad   : > { %v397_v2 = vmul.f32 %v840_v63, %v369_v55  ;;  %v355_v37 = vadd.f32 %v347_v27, %v820_v29  ;;  %v265_v55 = vmul.f32 %v817_v24, %v825_v35 }
  0xaf   : > { %v405_v8 = vadd.f32 %v397_v2, %v356_v5  ;;  %v313_v0 = vadd.f32 %v835_v53, %v265_v55 }
  0xb2   : > { %v328_v56 = vpop.permute.xlu1 %327  ;;  %v324_v57 = vpop.permute.xlu0 %323 }
  0xb3   : > { %v349_v16 = vmul.f32 %v828_v43, %v324_v57  ;;  %v350_v45 = vmul.f32 %v828_v43, %v328_v56 }
  0xb4   : > { %v381_v58 = vpop.permute.xlu2 %380 }
  0xb5   : > { %v357_v20 = vadd.f32 %v349_v16, %v308_v17  ;;  %v400_v46 = vmul.f32 %v840_v63, %v381_v58  ;;  %v358_v51 = vadd.f32 %v350_v45, %v823_v34 }
  0xb7   : > { %v408_v54 = vadd.f32 %v400_v46, %v359_v52 }
  0xba   : > { %v837_v59 = vpop.permute.xlu1 %335  ;;  %v344_v60 = vpop.permute.xlu0 %343 }
  0xbb   : > { %v354_v57 = vmul.f32 %v828_v43, %v344_v60  ;;  %v352_v34 = vmul.f32 %v828_v43, %v837_v59 }
  0xbc   : > { %v389_v61 = vpop.permute.xlu2 %388 }
  0xbd   : > { %v402_v30 = vmul.f32 %v840_v63, %v389_v61  ;;  %v360_v43 = vadd.f32 %v352_v34, %v833_v49 }
  0xbf   : > { %v410_v38 = vadd.f32 %v402_v30, %v361_v32 }
  0xc3   : > { %v365_v4 = vpop.permute.xlu1 %364 }
  0xc4   : > { %v373_v6 = vpop.permute.xlu0 %372  ;;  %v396_v26 = vmul.f32 %v840_v63, %v365_v4  ;;  %v362_v4 = vadd.f32 %v354_v57, %v313_v0 }
  0xc5   : > { %v418_v7 = vpop.permute.xlu2 %417  ;;  %v398_v18 = vmul.f32 %v840_v63, %v373_v6 }
  0xc6   : > { %v446_v9 = vmul.f32 %v844_v3, %v418_v7  ;;  %v404_v41 = vadd.f32 %v396_v26, %v355_v37 }
  0xc7   : > { %v406_v23 = vadd.f32 %v398_v18, %v357_v20 }
  0xc8   : > { %v454_v10 = vadd.f32 %v446_v9, %v405_v8 }
  0xca   : > { %v462_v11 = vmax.f32 %v454_v10, 0.0 }
  0xcb   : > { %v377_v12 = vpop.permute.xlu1 %376 }
  0xcc   : > { %v393_v13 = vpop.permute.xlu0 %392  ;;  %479 = vadd.xlane.f32.xlu2 %v462_v11  ;;  %v399_v47 = vmul.f32 %v840_v63, %v377_v12  ;;  %v519_v5 = vmul.f32 %v462_v11, %v462_v11 }
  0xcd   : > { %v430_v14 = vpop.permute.xlu2 %429  ;;  %v403_v52 = vmul.f32 %v840_v63, %v393_v13 }
  0xce   : > { %v449_v48 = vmul.f32 %v844_v3, %v430_v14  ;;  %v407_v58 = vadd.f32 %v399_v47, %v358_v51 }
  0xcf   : > { %v411_v59 = vadd.f32 %v403_v52, %v362_v4 }
  0xd0   : > { %v457_v62 = vadd.f32 %v449_v48, %v408_v54 }
  0xd2   : > { %v465_v60 = vmax.f32 %v457_v62, 0.0 }
  0xd3   : > { %v385_v19 = vpop.permute.xlu1 %384 }
  0xd4   : > { %v401_v24 = vmul.f32 %v840_v63, %v385_v19  ;;  %v702_v63 = vmov 0.0   ;;  %v522_v12 = vmul.f32 %v465_v60, %v465_v60 }
  0xd5   : > { %v422_v21 = vpop.permute.xlu0 %421  ;;  %v438_v28 = vpop.permute.xlu2 %437  ;;  %193 = vst.msk [vmem:[%s878_s5 + $0x8] sm:$0xff] %vm191_vm0, %v702_v63 }
  0xd6   : > { %v447_v25 = vmul.f32 %v844_v3, %v422_v21  ;;  %v451_v33 = vmul.f32 %v844_v3, %v438_v28  ;;  %v409_v7 = vadd.f32 %v401_v24, %v360_v43  ;;  %192 = vst.msk [vmem:[%s878_s5] sm:$0xff] %vm191_vm0, %v702_v63 }
  0xd7   : > { %194 = vst.msk [vmem:[%s878_s5 + $0x10] sm:$0xff] %vm191_vm0, %v702_v63 }
  0xd8   : > { %v455_v31 = vadd.f32 %v447_v25, %v406_v23  ;;  %v459_v44 = vadd.f32 %v451_v33, %v410_v38  ;;  %195 = vst.msk [vmem:[%s878_s5 + $0x18] sm:$0xff] %vm191_vm0, %v702_v63 }
  0xd9   : > { %196 = vst.msk [vmem:[%s878_s5 + $0x20] sm:$0xff] %vm191_vm0, %v702_v63 }
  0xda   : > { %v856_v36 = vmax.f32 %v455_v31, 0.0  ;;  %v467_v29 = vmax.f32 %v459_v44, 0.0  ;;  %197 = vst.msk [vmem:[%s878_s5 + $0x28] sm:$0xff] %vm191_vm0, %v702_v63 }
  0xdb   : > { %198 = vst.msk [vmem:[%s878_s5 + $0x30] sm:$0xff] %vm191_vm0, %v702_v63 }
  0xdc   : > { %481 = vadd.xlane.f32.xlu0 %v856_v36  ;;  %v414_v40 = vpop.permute.xlu1 %413  ;;  %199 = vst.msk [vmem:[%s878_s5 + $0x38] sm:$0xff] %vm191_vm0, %v702_v63  ;;  %v524_v17 = vmul.f32 %v467_v29, %v467_v29  ;;  %v470_v18 = vld [vmem:[%s878_s5 + $0x8] sm:$0xff] }
  0xdd   : > { %v445_v42 = vmul.f32 %v844_v3, %v414_v40  ;;  %v442_v1 = vpop.permute.xlu0 %441  ;;  %v469_v25 = vld [vmem:[%s878_s5] sm:$0xff] }
  0xde   : > { %v452_v35 = vmul.f32 %v844_v3, %v442_v1  ;;  %v471_v21 = vld [vmem:[%s878_s5 + $0x10] sm:$0xff] }
  0xdf   : > { %v453_v39 = vadd.f32 %v445_v42, %v404_v41  ;;  %v472_v32 = vld [vmem:[%s878_s5 + $0x18] sm:$0xff] }
  0xe0   : > { %v460_v9 = vadd.f32 %v452_v35, %v411_v59  ;;  %v473_v33 = vld [vmem:[%s878_s5 + $0x20] sm:$0xff] }
  0xe1   : > { %v461_v50 = vmax.f32 %v453_v39, 0.0  ;;  %v474_v45 = vld [vmem:[%s878_s5 + $0x28] sm:$0xff] }
  0xe2   : > { %v468_v11 = vmax.f32 %v460_v9, 0.0  ;;  %v475_v27 = vld [vmem:[%s878_s5 + $0x30] sm:$0xff] }
  0xe3   : > { %477 = vadd.xlane.f32.xlu1 %v461_v50  ;;  %v518_v13 = vmul.f32 %v461_v50, %v461_v50  ;;  %v476_v46 = vld [vmem:[%s878_s5 + $0x38] sm:$0xff] }
  0xe4   : > { %489 = vadd.xlane.f32.xlu0 %v467_v29  ;;  %v426_v56 = vpop.permute.xlu1 %425  ;;  %v525_v14 = vmul.f32 %v468_v11, %v468_v11 }
  0xe5   : > { %v448_v61 = vmul.f32 %v844_v3, %v426_v56 }
  0xe7   : > { %v456_v2 = vadd.f32 %v448_v61, %v407_v58 }
  0xe9   : > { %v464_v53 = vmax.f32 %v456_v2, 0.0 }
  0xeb   : > { %483 = vadd.xlane.f32.xlu2 %v464_v53  ;;  %485 = vadd.xlane.f32.xlu1 %v465_v60  ;;  %v521_v16 = vmul.f32 %v464_v53, %v464_v53 }
  0xec   : > { %528 = vadd.xlane.f32.xlu0 %v519_v5  ;;  %v434_v6 = vpop.permute.xlu1 %433 }
  0xed   : > { %v450_v8 = vmul.f32 %v844_v3, %v434_v6  ;;  %v520_v3 = vmul.f32 %v856_v36, %v856_v36 }
  0xef   : > { %v458_v49 = vadd.f32 %v450_v8, %v409_v7 }
  0xf1   : > { %v466_v10 = vmax.f32 %v458_v49, 0.0 }
  0xf3   : > { %487 = vadd.xlane.f32.xlu2 %v466_v10  ;;  %491 = vadd.xlane.f32.xlu1 %v468_v11  ;;  %v523_v15 = vmul.f32 %v466_v10, %v466_v10 }
  0xf4   : > { %534 = vadd.xlane.f32.xlu0 %v522_v12 }
  0xfb   : > { %530 = vadd.xlane.f32.xlu1 %v520_v3  ;;  %526 = vadd.xlane.f32.xlu2 %v518_v13 }
  0xfc   : > { %540 = vadd.xlane.f32.xlu0 %v525_v14 }
 0x103   : > { %536 = vadd.xlane.f32.xlu1 %v523_v15  ;;  %532 = vadd.xlane.f32.xlu2 %v521_v16 }
 0x10b   : > { %538 = vadd.xlane.f32.xlu2 %v524_v17 }
 0x13f   : > { %v480_v19 = vpop.xlane.xlu2 %479 }
 0x140   : > { %v494_v20 = vadd.f32 %v480_v19, %v470_v18 }
 0x142   : > { %503 = vst.msk [vmem:[%s878_s5 + $0x8] sm:$0xff] %vm501_vm1, %v494_v20 }
 0x149   : > { %v511_v40 = vld [vmem:[%s878_s5 + $0x8] sm:$0xff] }
 0x14f   : > { %v482_v22 = vpop.xlane.xlu0 %481 }
 0x150   : > { %v495_v23 = vadd.f32 %v482_v22, %v471_v21 }
 0x152   : > { %504 = vst.msk [vmem:[%s878_s5 + $0x10] sm:$0xff] %vm501_vm1, %v495_v23 }
 0x156   : > { %v478_v28 = vpop.xlane.xlu1 %477 }
 0x157   : > { %v490_v30 = vpop.xlane.xlu0 %489  ;;  %v493_v31 = vadd.f32 %v478_v28, %v469_v25 }
 0x158   : > { %v499_v26 = vadd.f32 %v490_v30, %v475_v27 }
 0x159   : > { %502 = vst.msk [vmem:[%s878_s5] sm:$0xff] %vm501_vm1, %v493_v31  ;;  %v512_v55 = vld [vmem:[%s878_s5 + $0x10] sm:$0xff] }
 0x15a   : > { %508 = vst.msk [vmem:[%s878_s5 + $0x30] sm:$0xff] %vm501_vm1, %v499_v26 }
 0x15e   : > { %v484_v36 = vpop.xlane.xlu2 %483  ;;  %v486_v37 = vpop.xlane.xlu1 %485 }
 0x15f   : > { %v496_v38 = vadd.f32 %v484_v36, %v472_v32  ;;  %v529_v41 = vpop.xlane.xlu0 %528  ;;  %v497_v42 = vadd.f32 %v486_v37, %v473_v33 }
 0x160   : > { %v543_v44 = vadd.f32 %v529_v41, %v511_v40  ;;  %v510_v56 = vld [vmem:[%s878_s5] sm:$0xff] }
 0x161   : > { %505 = vst.msk [vmem:[%s878_s5 + $0x18] sm:$0xff] %vm501_vm1, %v496_v38  ;;  %v516_v60 = vld [vmem:[%s878_s5 + $0x30] sm:$0xff] }
 0x162   : > { %552 = vst.msk [vmem:[%s878_s5 + $0x8] sm:$0xff] %vm550_vm2, %v543_v44 }
 0x163   : > { %506 = vst.msk [vmem:[%s878_s5 + $0x20] sm:$0xff] %vm501_vm1, %v497_v42 }
 0x166   : > { %v488_v39 = vpop.xlane.xlu2 %487  ;;  %v492_v47 = vpop.xlane.xlu1 %491 }
 0x167   : > { %v498_v48 = vadd.f32 %v488_v39, %v474_v45  ;;  %v535_v50 = vpop.xlane.xlu0 %534  ;;  %v500_v29 = vadd.f32 %v492_v47, %v476_v46 }
 0x168   : > { %v513_v4 = vld [vmem:[%s878_s5 + $0x18] sm:$0xff] }
 0x169   : > { %507 = vst.msk [vmem:[%s878_s5 + $0x28] sm:$0xff] %vm501_vm1, %v498_v48 }
 0x16a   : > { %v514_v51 = vld [vmem:[%s878_s5 + $0x20] sm:$0xff]  ;;  %509 = vst.msk [vmem:[%s878_s5 + $0x38] sm:$0xff] %vm501_vm1, %v500_v29 }
 0x16b   : > { %v546_v54 = vadd.f32 %v535_v50, %v514_v51 }
 0x16d   : > { %555 = vst.msk [vmem:[%s878_s5 + $0x20] sm:$0xff] %vm550_vm2, %v546_v54 }
 0x16e   : > { %v531_v57 = vpop.xlane.xlu1 %530  ;;  %v527_v58 = vpop.xlane.xlu2 %526 }
 0x16f   : > { %v544_v61 = vadd.f32 %v531_v57, %v512_v55  ;;  %v542_v62 = vadd.f32 %v527_v58, %v510_v56  ;;  %v541_v0 = vpop.xlane.xlu0 %540 }
 0x170   : > { %v515_v52 = vld [vmem:[%s878_s5 + $0x28] sm:$0xff] }
 0x171   : > { %v517_v1 = vld [vmem:[%s878_s5 + $0x38] sm:$0xff]  ;;  %553 = vst.msk [vmem:[%s878_s5 + $0x10] sm:$0xff] %vm550_vm2, %v544_v61 }
 0x172   : > { %v549_v34 = vadd.f32 %v541_v0, %v517_v1  ;;  %551 = vst.msk [vmem:[%s878_s5] sm:$0xff] %vm550_vm2, %v542_v62 }
 0x174   : > { %558 = vst.msk [vmem:[%s878_s5 + $0x38] sm:$0xff] %vm550_vm2, %v549_v34 }
 0x176   : > { %v537_v2 = vpop.xlane.xlu1 %536  ;;  %v533_v24 = vpop.xlane.xlu2 %532 }
 0x177   : > { %v547_v35 = vadd.f32 %v537_v2, %v515_v52  ;;  %v545_v53 = vadd.f32 %v533_v24, %v513_v4 }
 0x179   : > { %556 = vst.msk [vmem:[%s878_s5 + $0x28] sm:$0xff] %vm550_vm2, %v547_v35 }
 0x17a   : > { %554 = vst.msk [vmem:[%s878_s5 + $0x18] sm:$0xff] %vm550_vm2, %v545_v53 }
 0x17e   : > { %v539_v5 = vpop.xlane.xlu2 %538 }
 0x17f   : > { %v548_v43 = vadd.f32 %v539_v5, %v516_v60 }
 0x181   : > { %557 = vst.msk [vmem:[%s878_s5 + $0x30] sm:$0xff] %vm550_vm2, %v548_v43 }
 0x182 PF: > { %s13_s14 = sadd.s32 1, %s696_s14   ;;  %s963_s12 = smov %s692_s13 }
 0x183   : > { %p10_p5 = scmp.ge.s32.totalorder %s13_s14, 4   ;;  %s964_s13 = smov %s966_s15 }
 0x185   :  { %12 = sbr.rel (!%p10_p5) target bundleno = 2 (0x2), region = 66 }

// kernel: simple_ctc_forward.3
= control target key start
LH: loop header
LB: loop body
LE: loop exit
PB: predicated region body
PF: predicated region fallthrough
CT: control target
= control target key end

     0   :  { %s852_s18 = smov 0   ;;  %s1049_s0 = inlined_call_operand.vmem [shape: f32[4,256], index: 0, kind: input, shape index: {}]   ;;  %s1050_s1 = inlined_call_operand.vmem [shape: f32[64,4], index: 1, kind: input, shape index: {}]   ;;  %s1051_s2 = inlined_call_operand.vmem [shape: f32[64,1], index: 2, kind: input, shape index: {}]   ;;  %s1052_s3 = inlined_call_operand.vmem [shape: bf16[64,32], index: 3, kind: input, shape index: {}]   ;;  %s1053_s4 = inlined_call_operand.vmem [shape: f32[1,32], index: 4, kind: input, shape index: {}]   ;;  %s1054_s5 = inlined_call_operand.vmem [shape: f32[256,32], index: 5, kind: output, shape index: {}]  }
   0x1 LB: > { %s858_s19 = sadd.s32 4294967295, %s816_s18   ;;  %p720_p0 = scmp.ge.s32.totalorder %s816_s18, 1  ;;  %s816_s18 = sphi %s852_s18, %s15_s18  }
   0x2   : > { %p186_p1 = scmp.lt.s32.totalorder %s816_s18, 3 }
   0x4   : > { %p187_p2 = pnand %p720_p0, %p186_p1 }
   0x5   : > { %p213_p3 = scmp.lt.s32.totalorder (!%p187_p2), %s858_s19, 1  ;;  %s722_s17 = sshll.u32 (!%p187_p2), %s858_s19, 4 }
   0x6   : > { %190 = sbr.rel (%p187_p2) target bundleno = 620 (0x26c), region = 40  ;;  %p218_p4 = scmp.lt.s32.totalorder (!%p187_p2), %s722_s17, 31 }
   0xb   : > { %v234_v0 = vld [vmem:[%s1050_s1 + $0x8] sm:$0xff]  ;;  %v233_v1 = vld [vmem:[%s1050_s1] sm:$0xff]  ;;  %v818_v2 = vmov 2   ;;  %v819_v3 = vmov 1   ;;  %v235_v4 = vld [vmem:[%s1050_s1 + $0x10] sm:$0xff]  ;;  %v820_v6 = vmov 0  }
   0xc   : > { %781 = vset.pattern.permute.xlu2 %v818_v2  ;;  %783 = vset.pattern.permute.xlu0 %v819_v3  ;;  %v226_v5 = vld [vmem:[%s1051_s2 + $0x8] sm:$0xff]  ;;  %v821_v7 = vmov 3   ;;  %v236_v8 = vld [vmem:[%s1050_s1 + $0x18] sm:$0xff]  ;;  %v227_v9 = vld [vmem:[%s1051_s2 + $0x10] sm:$0xff]  ;;  %s214_s29 = scalar_select %p213_p3, %s858_s19, 1  ;;  %vm569_vm0 = vcmask 523264  }
   0xd   : > { %779 = vset.pattern.permute.xlu1 %v819_v3  ;;  %343 = vperm.xlu0 %783, %v234_v0   ;;  %v225_v10 = vld [vmem:[%s1051_s2] sm:$0xff]  ;;  %v228_v11 = vld [vmem:[%s1051_s2 + $0x18] sm:$0xff]  ;;  %v238_v12 = vld [vmem:[%s1050_s1 + $0x28] sm:$0xff]  ;;  %s1056_s17 = smov (!%p218_p4, %s722_s17), 31  ;;  %vm643_vm1 = vcmask 261120  }
   0xe   : > { %388 = vperm.xlu2 %781, %v233_v1   ;;  %339 = vperm.xlu1 %779, %v233_v1   ;;  %v237_v13 = vld [vmem:[%s1050_s1 + $0x20] sm:$0xff]  ;;  %v239_v14 = vld [vmem:[%s1050_s1 + $0x30] sm:$0xff]  ;;  %v230_v17 = vld [vmem:[%s1051_s2 + $0x28] sm:$0xff]  ;;  %s721_s30 = sshll.u32 %s214_s29, 2  ;;  %s723_s20 = sshll.u32 %s1056_s17, 3 }
   0xf   : > { %v229_v15 = vld [vmem:[%s1051_s2 + $0x20] sm:$0xff]  ;;  %v231_v16 = vld [vmem:[%s1051_s2 + $0x30] sm:$0xff]  ;;  %v240_v18 = vld [vmem:[%s1050_s1 + $0x38] sm:$0xff]  ;;  %s216_s8 = scalar_lea.vmem %s1049_s0, %s721_s30  ;;  %s1012_s25 = scalar_lea.vmem %s1054_s5, %s723_s20 }
  0x10   : > { %v232_v21 = vld [vmem:[%s1051_s2 + $0x38] sm:$0xff]  ;;  %v224_v35 = vld [vmem:[%s216_s8] sm:$0xf] }
  0x11   : > { %v945_v37 = vperm.slane %v224_v35, 0  ;;  %v947_v38 = vperm.slane %v224_v35, 1  ;;  %v950_v41 = vperm.slane %v224_v35, 2  ;;  %v953_v44 = vperm.slane %v224_v35, 3 }
  0x15   : > { %347 = vperm.xlu0 %783, %v235_v4  }
  0x16   : > { %782 = vset.pattern.permute.xlu2 %v820_v6  ;;  %780 = vset.pattern.permute.xlu1 %v820_v6 }
  0x17   : > { %248 = vperm.xlu1 %780, %v234_v0   ;;  %297 = vperm.xlu2 %782, %v226_v5  }
  0x1d   : > { %789 = vset.pattern.permute.xlu0 %v818_v2 }
  0x1e   : > { %396 = vperm.xlu0 %789, %v235_v4  }
  0x1f   : > { %253 = vperm.xlu1 %780, %v235_v4   ;;  %784 = vset.pattern.permute.xlu2 %v821_v7 }
  0x20   : > { %437 = vperm.xlu2 %784, %v233_v1  }
  0x26   : > { %400 = vperm.xlu0 %789, %v236_v8  }
  0x27   : > { %785 = vset.pattern.permute.xlu1 %v818_v2 }
  0x28   : > { %392 = vperm.xlu1 %785, %v234_v0   ;;  %786 = vset.pattern.permute.xlu2 %v820_v6 }
  0x29   : > { %302 = vperm.xlu2 %786, %v227_v9  }
  0x2e   : > { %792 = vset.pattern.permute.xlu0 %v820_v6 }
  0x2f   : > { %243 = vperm.xlu0 %792, %v233_v1  }
  0x30   : > { %787 = vset.pattern.permute.xlu1 %v820_v6 }
  0x31   : > { %258 = vperm.xlu1 %787, %v236_v8   ;;  %788 = vset.pattern.permute.xlu2 %v821_v7 }
  0x32   : > { %441 = vperm.xlu2 %788, %v234_v0  }
  0x37   : > { %292 = vperm.xlu0 %792, %v225_v10  }
  0x39   : > { %307 = vperm.xlu1 %787, %v228_v11  }
  0x3a   : > { %790 = vset.pattern.permute.xlu2 %v819_v3 }
  0x3b   : > { %351 = vperm.xlu2 %790, %v236_v8  }
  0x3f   : > { %268 = vperm.xlu0 %792, %v238_v12  }
  0x41   : > { %263 = vperm.xlu1 %787, %v237_v13  }
  0x43   : > { %791 = vset.pattern.permute.xlu2 %v821_v7 }
  0x44   : > { %445 = vperm.xlu2 %791, %v235_v4  }
  0x47   : > { %273 = vperm.xlu0 %792, %v239_v14  }
  0x49   : > { %312 = vperm.xlu1 %787, %v229_v15  }
  0x4c   : > { %793 = vset.pattern.permute.xlu2 %v819_v3 }
  0x4d   : > { %355 = vperm.xlu2 %793, %v237_v13  }
  0x4f   : > { %322 = vperm.xlu0 %792, %v231_v16  }
  0x51   : > { %794 = vset.pattern.permute.xlu1 %v821_v7 }
  0x52   : > { %449 = vperm.xlu1 %794, %v236_v8  }
  0x55   : > { %795 = vset.pattern.permute.xlu2 %v818_v2 }
  0x56   : > { %404 = vperm.xlu2 %795, %v237_v13  }
  0x57   : > { %802 = vset.pattern.permute.xlu0 %v821_v7 }
  0x58   : > { %457 = vperm.xlu0 %802, %v238_v12  }
  0x5a   : > { %796 = vset.pattern.permute.xlu1 %v820_v6 }
  0x5b   : > { %317 = vperm.xlu1 %796, %v230_v17  }
  0x5e   : > { %797 = vset.pattern.permute.xlu2 %v819_v3 }
  0x5f   : > { %359 = vperm.xlu2 %797, %v238_v12  }
  0x60   : > { %806 = vset.pattern.permute.xlu0 %v818_v2 }
  0x61   : > { %416 = vperm.xlu0 %806, %v240_v18  }
  0x63   : > { %798 = vset.pattern.permute.xlu1 %v821_v7 }
  0x64   : > { %453 = vperm.xlu1 %798, %v237_v13  }
  0x67   : > { %799 = vset.pattern.permute.xlu2 %v818_v2 }
  0x68   : > { %408 = vperm.xlu2 %799, %v238_v12   ;;  %v389_v19 = vpop.permute.xlu2 %388 }
  0x69   : > { %808 = vset.pattern.permute.xlu0 %v821_v7  ;;  %v420_v48 = vmul.f32 %v950_v41, %v389_v19 }
  0x6c   : > { %800 = vset.pattern.permute.xlu1 %v819_v3 }
  0x6d   : > { %363 = vperm.xlu1 %800, %v239_v14  }
  0x70   : > { %801 = vset.pattern.permute.xlu2 %v820_v6 }
  0x71   : > { %278 = vperm.xlu2 %801, %v240_v18   ;;  %v298_v20 = vpop.permute.xlu2 %297 }
  0x75   : > { %803 = vset.pattern.permute.xlu1 %v818_v2 }
  0x76   : > { %412 = vperm.xlu1 %803, %v239_v14  }
  0x79   : > { %327 = vperm.xlu2 %801, %v232_v21  }
  0x7a   : > { %v438_v22 = vpop.permute.xlu2 %437 }
  0x7b   : > { %v469_v52 = vmul.f32 %v953_v44, %v438_v22 }
  0x7e   : > { %804 = vset.pattern.permute.xlu1 %v819_v3 }
  0x7f   : > { %367 = vperm.xlu1 %804, %v240_v18   ;;  %v344_v23 = vpop.permute.xlu0 %343 }
  0x80   : > { %v340_v24 = vpop.permute.xlu1 %339  ;;  %v372_v49 = vmul.f32 %v947_v38, %v344_v23 }
  0x81   : > { %805 = vset.pattern.permute.xlu2 %v821_v7  ;;  %v371_v45 = vmul.f32 %v947_v38, %v340_v24 }
  0x82   : > { %461 = vperm.xlu2 %805, %v239_v14  }
  0x83   : > { %v303_v26 = vpop.permute.xlu2 %302 }
  0x87   : > { %807 = vset.pattern.permute.xlu1 %v821_v7  ;;  %v348_v25 = vpop.permute.xlu0 %347 }
  0x88   : > { %465 = vperm.xlu1 %807, %v240_v18   ;;  %v373_v63 = vmul.f32 %v947_v38, %v348_v25 }
  0x89   : > { %v249_v27 = vpop.permute.xlu1 %248 }
  0x8a   : > { %v283_v42 = vmul.f32 %v945_v37, %v249_v27 }
  0x8c   : > { %v442_v30 = vpop.permute.xlu2 %441  ;;  %v331_v50 = vadd.f32 %v298_v20, %v283_v42 }
  0x8d   : > { %v470_v59 = vmul.f32 %v953_v44, %v442_v30 }
  0x8e   : > { %v380_v57 = vadd.f32 %v372_v49, %v331_v50 }
  0x90   : > { %v397_v28 = vpop.permute.xlu0 %396 }
  0x91   : > { %v254_v29 = vpop.permute.xlu1 %253  ;;  %v422_v3 = vmul.f32 %v950_v41, %v397_v28 }
  0x92   : > { %v284_v56 = vmul.f32 %v945_v37, %v254_v29 }
  0x94   : > { %v332_v0 = vadd.f32 %v303_v26, %v284_v56 }
  0x95   : > { %v352_v33 = vpop.permute.xlu2 %351 }
  0x96   : > { %v381_v2 = vadd.f32 %v373_v63, %v332_v0  ;;  %v374_v11 = vmul.f32 %v947_v38, %v352_v33 }
  0x98   : > { %v401_v31 = vpop.permute.xlu0 %400  ;;  %v430_v9 = vadd.f32 %v422_v3, %v381_v2 }
  0x99   : > { %v423_v17 = vmul.f32 %v950_v41, %v401_v31 }
  0x9a   : > { %v393_v32 = vpop.permute.xlu1 %392 }
  0x9b   : > { %v421_v53 = vmul.f32 %v950_v41, %v393_v32 }
  0x9d   : > { %v429_v60 = vadd.f32 %v421_v53, %v380_v57  ;;  %v753_v53 = vld [vmem:[%s1052_s3 + $0x18] sm:$0xff] }
  0x9e   : > { %v446_v39 = vpop.permute.xlu2 %445  ;;  %598 = vmatpush.bf16.msra.mxu0 %v753_v53  ;;  %754 = vmatpush.bf16.msra.mxu1 %v753_v53 }
  0x9f   : > { %v478_v1 = vadd.f32 %v470_v59, %v429_v60  ;;  %v471_v6 = vmul.f32 %v953_v44, %v446_v39  ;;  %755 = vmatpush.bf16.msra.mxu2 %v753_v53  ;;  %756 = vmatpush.bf16.msra.mxu3 %v753_v53 }
  0xa1   : > { %v244_v34 = vpop.permute.xlu0 %243  ;;  %v486_v5 = vmax.f32 %v478_v1, 0.0  ;;  %v479_v13 = vadd.f32 %v471_v6, %v430_v9 }
  0xa2   : > { %v282_v40 = vmul.f32 %v945_v37, %v244_v34 }
  0xa3   : > { %v259_v36 = vpop.permute.xlu1 %258  ;;  %v487_v16 = vmax.f32 %v479_v13, 0.0 }
  0xa4   : > { %v285_v7 = vmul.f32 %v945_v37, %v259_v36 }
  0xa7   : > { %v356_v55 = vpop.permute.xlu2 %355 }
  0xa8   : > { %v375_v27 = vmul.f32 %v947_v38, %v356_v55  ;;  %v752_v55 = vld [vmem:[%s1052_s3 + $0x10] sm:$0xff] }
  0xa9   : > { %v293_v43 = vpop.permute.xlu0 %292  ;;  %599 = vmatpush.bf16.msra.mxu0 %v752_v55  ;;  %757 = vmatpush.bf16.msra.mxu1 %v752_v55 }
  0xaa   : > { %v330_v46 = vadd.f32 %v293_v43, %v282_v40  ;;  %758 = vmatpush.bf16.msra.mxu2 %v752_v55  ;;  %759 = vmatpush.bf16.msra.mxu3 %v752_v55 }
  0xab   : > { %v308_v47 = vpop.permute.xlu1 %307 }
  0xac   : > { %v379_v51 = vadd.f32 %v371_v45, %v330_v46  ;;  %v333_v12 = vadd.f32 %v308_v47, %v285_v7 }
  0xae   : > { %v428_v54 = vadd.f32 %v420_v48, %v379_v51  ;;  %v382_v15 = vadd.f32 %v374_v11, %v333_v12 }
  0xb0   : > { %v477_v58 = vadd.f32 %v469_v52, %v428_v54  ;;  %v405_v4 = vpop.permute.xlu2 %404  ;;  %v431_v19 = vadd.f32 %v423_v17, %v382_v15 }
  0xb1   : > { %v269_v10 = vpop.permute.xlu0 %268  ;;  %v424_v33 = vmul.f32 %v950_v41, %v405_v4 }
  0xb2   : > { %v485_v61 = vmax.f32 %v477_v58, 0.0  ;;  %v287_v30 = vmul.f32 %v945_v37, %v269_v10 }
  0xb3   : > { %v264_v62 = vpop.permute.xlu1 %263 }
  0xb4   : > { %493 = vxpose.xlu2.b32.start [1/8] (short) %v485_v61, 128  ;;  %v286_v25 = vmul.f32 %v945_v37, %v264_v62 }
  0xb9   : > { %v360_v14 = vpop.permute.xlu2 %359  ;;  %v274_v21 = vpop.permute.xlu0 %273 }
  0xba   : > { %v376_v34 = vmul.f32 %v947_v38, %v360_v14  ;;  %v288_v56 = vmul.f32 %v945_v37, %v274_v21 }
  0xbb   : > { %v313_v8 = vpop.permute.xlu1 %312 }
  0xbc   : > { %494 = vxpose.xlu2.b32.cont [2/8] (short) %v486_v5, 128  ;;  %v334_v28 = vadd.f32 %v313_v8, %v286_v25 }
  0xbe   : > { %v383_v32 = vadd.f32 %v375_v27, %v334_v28 }
  0xc0   : > { %v432_v39 = vadd.f32 %v424_v33, %v383_v32 }
  0xc1   : > { %v323_v29 = vpop.permute.xlu0 %322 }
  0xc2   : > { %v409_v24 = vpop.permute.xlu2 %408  ;;  %v336_v59 = vadd.f32 %v323_v29, %v288_v56 }
  0xc3   : > { %v425_v42 = vmul.f32 %v950_v41, %v409_v24 }
  0xc4   : > { %v450_v18 = vpop.permute.xlu1 %449  ;;  %495 = vxpose.xlu2.b32.cont [3/8] (short) %v487_v16, 128 }
  0xc5   : > { %v472_v20 = vmul.f32 %v953_v44, %v450_v18 }
  0xc7   : > { %v480_v22 = vadd.f32 %v472_v20, %v431_v19 }
  0xc9   : > { %v488_v23 = vmax.f32 %v480_v22, 0.0 }
  0xca   : > { %v458_v45 = vpop.permute.xlu0 %457 }
  0xcb   : > { %v279_v31 = vpop.permute.xlu2 %278  ;;  %v474_v48 = vmul.f32 %v953_v44, %v458_v45 }
  0xcc   : > { %496 = vxpose.xlu2.b32.cont [4/8] (short) %v488_v23, 128  ;;  %v289_v3 = vmul.f32 %v945_v37, %v279_v31  ;;  %v751_v37 = vld [vmem:[%s1052_s3 + $0x8] sm:$0xff] }
  0xcd   : > { %v318_v26 = vpop.permute.xlu1 %317  ;;  %600 = vmatpush.bf16.msra.mxu0 %v751_v37  ;;  %760 = vmatpush.bf16.msra.mxu1 %v751_v37 }
  0xce   : > { %v335_v35 = vadd.f32 %v318_v26, %v287_v30  ;;  %761 = vmatpush.bf16.msra.mxu2 %v751_v37  ;;  %762 = vmatpush.bf16.msra.mxu3 %v751_v37 }
  0xd0   : > { %v384_v40 = vadd.f32 %v376_v34, %v335_v35 }
  0xd2   : > { %v433_v47 = vadd.f32 %v425_v42, %v384_v40 }
  0xd3   : > { %v328_v50 = vpop.permute.xlu2 %327  ;;  %v417_v6 = vpop.permute.xlu0 %416 }
  0xd4   : > { %v482_v51 = vadd.f32 %v474_v48, %v433_v47  ;;  %v337_v7 = vadd.f32 %v328_v50, %v289_v3  ;;  %v427_v9 = vmul.f32 %v950_v41, %v417_v6 }
  0xd6   : > { %v454_v36 = vpop.permute.xlu1 %453  ;;  %v490_v54 = vmax.f32 %v482_v51, 0.0 }
  0xd7   : > { %v473_v43 = vmul.f32 %v953_v44, %v454_v36 }
  0xd9   : > { %v481_v46 = vadd.f32 %v473_v43, %v432_v39  ;;  %v809_v39 = vld [vmem:[%s1053_s4] ss:$0 sm:$0xff] }
  0xdb   : > { %v489_v49 = vmax.f32 %v481_v46, 0.0 }
  0xdc   : > { %v462_v58 = vpop.permute.xlu2 %461 }
  0xdd   : > { %497 = vxpose.xlu2.b32.cont [5/8] (short) %v489_v49, 128  ;;  %v475_v63 = vmul.f32 %v953_v44, %v462_v58 }
  0xdf   : > { %v364_v52 = vpop.permute.xlu1 %363 }
  0xe0   : > { %v377_v57 = vmul.f32 %v947_v38, %v364_v52 }
  0xe2   : > { %v385_v61 = vadd.f32 %v377_v57, %v336_v59 }
  0xe5   : > { %498 = vxpose.xlu2.b32.cont [6/8] (short) %v490_v54, 128 }
  0xe8   : > { %v413_v60 = vpop.permute.xlu1 %412 }
  0xe9   : > { %v426_v62 = vmul.f32 %v950_v41, %v413_v60 }
  0xeb   : > { %v434_v0 = vadd.f32 %v426_v62, %v385_v61 }
  0xed   : > { %v483_v1 = vadd.f32 %v475_v63, %v434_v0 }
  0xef   : > { %v491_v2 = vmax.f32 %v483_v1, 0.0 }
  0xf1   : > { %v368_v4 = vpop.permute.xlu1 %367  ;;  %499 = vxpose.xlu2.b32.cont [7/8] (short) %v491_v2, 128 }
  0xf2   : > { %v378_v5 = vmul.f32 %v947_v38, %v368_v4  ;;  %v750_v38 = vld [vmem:[%s1052_s3] sm:$0xff] }
  0xf3   : > { %601 = vmatpush.bf16.msra.mxu0 %v750_v38  ;;  %763 = vmatpush.bf16.msra.mxu1 %v750_v38 }
  0xf4   : > { %v386_v8 = vadd.f32 %v378_v5, %v337_v7  ;;  %764 = vmatpush.bf16.msra.mxu2 %v750_v38  ;;  %765 = vmatpush.bf16.msra.mxu3 %v750_v38 }
  0xf6   : > { %v435_v11 = vadd.f32 %v427_v9, %v386_v8 }
  0xfa   : > { %v466_v10 = vpop.permute.xlu1 %465 }
  0xfb   : > { %v476_v12 = vmul.f32 %v953_v44, %v466_v10 }
  0xfd   : > { %v484_v13 = vadd.f32 %v476_v12, %v435_v11 }
  0xff   : > { %v492_v14 = vmax.f32 %v484_v13, 0.0 }
 0x101   : > { %500 = vxpose.xlu2.b32.end [8/8] (short) %v492_v14, 128 }
 0x162   : > { %v509_v41 = vpop.trf.xlu2 }
 0x16a   : > { %v510_v44 = vpop.trf.xlu2 }
 0x16b   : > { %v525_v15 = vpack.c.bf16 %v510_v44, %v509_v41 }
 0x16d   : > { %740 = vmatmul.msk.bf16.vlgmr.msra.gmra.mxu0 %vm569_vm0, %v525_v15 }
 0x172   : > { %v511_v16 = vpop.trf.xlu2 }
 0x17a   : > { %v512_v17 = vpop.trf.xlu2 }
 0x17b   : > { %v526_v18 = vpack.c.bf16 %v512_v17, %v511_v16 }
 0x17d   : > { %741 = vmatmul.msk.bf16.gmra.mxu0 %vm569_vm0, %v526_v18 }
 0x182   : > { %v513_v19 = vpop.trf.xlu2 }
 0x18a   : > { %v514_v20 = vpop.trf.xlu2 }
 0x18b   : > { %v527_v21 = vpack.c.bf16 %v514_v20, %v513_v19 }
 0x18d   : > { %742 = vmatmul.msk.bf16.vlgmr.msra.gmra.mxu1 %vm569_vm0, %v527_v21 }
 0x192   : > { %v515_v22 = vpop.trf.xlu2 }
 0x19a   : > { %v516_v23 = vpop.trf.xlu2 }
 0x19b   : > { %v528_v24 = vpack.c.bf16 %v516_v23, %v515_v22 }
 0x19d   : > { %743 = vmatmul.msk.bf16.gmra.mxu1 %vm569_vm0, %v528_v24 }
 0x1a2   : > { %v517_v25 = vpop.trf.xlu2 }
 0x1aa   : > { %v518_v26 = vpop.trf.xlu2 }
 0x1ab   : > { %v529_v27 = vpack.c.bf16 %v518_v26, %v517_v25 }
 0x1ad   : > { %744 = vmatmul.msk.bf16.vlgmr.msra.gmra.mxu2 %vm569_vm0, %v529_v27 }
 0x1b2   : > { %v519_v28 = vpop.trf.xlu2 }
 0x1ba   : > { %v520_v29 = vpop.trf.xlu2 }
 0x1bb   : > { %v530_v30 = vpack.c.bf16 %v520_v29, %v519_v28 }
 0x1bd   : > { %745 = vmatmul.msk.bf16.gmra.mxu2 %vm569_vm0, %v530_v30 }
 0x1c2   : > { %v521_v31 = vpop.trf.xlu2 }
 0x1ca   : > { %v522_v32 = vpop.trf.xlu2 }
 0x1cb   : > { %v531_v33 = vpack.c.bf16 %v522_v32, %v521_v31 }
 0x1cd   : > { %746 = vmatmul.msk.bf16.vlgmr.msra.gmra.mxu3 %vm569_vm0, %v531_v33 }
 0x1d2   : > { %v523_v34 = vpop.trf.xlu2 }
 0x1da   : > { %v524_v35 = vpop.trf.xlu2 }
 0x1db   : > { %v532_v36 = vpack.c.bf16 %v524_v35, %v523_v34 }
 0x1dd   : > { %747 = vmatmul.msk.bf16.gmra.mxu3 %vm569_vm0, %v532_v36 }
 0x1ea   : > { %v603_v40 = vpop.f32.mrf.mxu0 }
 0x1eb   : > { %v604_v42 = vadd.f32 %v809_v39, %v603_v40 }
 0x1ed   : > { %644 = vst.msk [vmem:[%s1012_s25] sm:$0xff] %vm643_vm1, %v604_v42 }
 0x1f2   : > { %v605_v43 = vpop.f32.mrf.mxu0 }
 0x1f3   : > { %v606_v45 = vadd.f32 %v809_v39, %v605_v43 }
 0x1f5   : > { %645 = vst.msk [vmem:[%s1012_s25 + $0x8] sm:$0xff] %vm643_vm1, %v606_v45 }
 0x1fa   : > { %v608_v46 = vpop.f32.mrf.mxu0 }
 0x1fb   : > { %v609_v47 = vadd.f32 %v809_v39, %v608_v46 }
 0x1fd   : > { %646 = vst.msk [vmem:[%s1012_s25 + $0x10] sm:$0xff] %vm643_vm1, %v609_v47 }
 0x202   : > { %v610_v48 = vpop.f32.mrf.mxu0 }
 0x203   : > { %v611_v49 = vadd.f32 %v809_v39, %v610_v48 }
 0x205   : > { %647 = vst.msk [vmem:[%s1012_s25 + $0x18] sm:$0xff] %vm643_vm1, %v611_v49 }
 0x20a   : > { %v613_v50 = vpop.f32.mrf.mxu1 }
 0x20b   : > { %v614_v51 = vadd.f32 %v809_v39, %v613_v50 }
 0x20d   : > { %648 = vst.msk [vmem:[%s1012_s25 + $0x20] sm:$0xff] %vm643_vm1, %v614_v51 }
 0x212   : > { %v615_v52 = vpop.f32.mrf.mxu1 }
 0x213   : > { %v616_v53 = vadd.f32 %v809_v39, %v615_v52 }
 0x215   : > { %649 = vst.msk [vmem:[%s1012_s25 + $0x28] sm:$0xff] %vm643_vm1, %v616_v53 }
 0x21a   : > { %v618_v54 = vpop.f32.mrf.mxu1 }
 0x21b   : > { %v619_v55 = vadd.f32 %v809_v39, %v618_v54 }
 0x21d   : > { %650 = vst.msk [vmem:[%s1012_s25 + $0x30] sm:$0xff] %vm643_vm1, %v619_v55 }
 0x222   : > { %v620_v56 = vpop.f32.mrf.mxu1 }
 0x223   : > { %v621_v57 = vadd.f32 %v809_v39, %v620_v56 }
 0x225   : > { %651 = vst.msk [vmem:[%s1012_s25 + $0x38] sm:$0xff] %vm643_vm1, %v621_v57 }
 0x230   : > { %v623_v58 = vpop.f32.mrf.mxu2 }
 0x231   : > { %v624_v59 = vadd.f32 %v809_v39, %v623_v58 }
 0x233   : > { %652 = vst.msk [vmem:[%s1012_s25 + $0x40] sm:$0xff] %vm643_vm1, %v624_v59 }
 0x238   : > { %v625_v60 = vpop.f32.mrf.mxu2 }
 0x239   : > { %v626_v61 = vadd.f32 %v809_v39, %v625_v60 }
 0x23b   : > { %653 = vst.msk [vmem:[%s1012_s25 + $0x48] sm:$0xff] %vm643_vm1, %v626_v61 }
 0x240   : > { %v628_v62 = vpop.f32.mrf.mxu2 }
 0x241   : > { %v629_v63 = vadd.f32 %v809_v39, %v628_v62 }
 0x243   : > { %654 = vst.msk [vmem:[%s1012_s25 + $0x50] sm:$0xff] %vm643_vm1, %v629_v63 }
 0x248   : > { %v630_v0 = vpop.f32.mrf.mxu2 }
 0x249   : > { %v631_v1 = vadd.f32 %v809_v39, %v630_v0 }
 0x24b   : > { %655 = vst.msk [vmem:[%s1012_s25 + $0x58] sm:$0xff] %vm643_vm1, %v631_v1 }
 0x250   : > { %v633_v2 = vpop.f32.mrf.mxu3 }
 0x251   : > { %v634_v3 = vadd.f32 %v809_v39, %v633_v2 }
 0x253   : > { %656 = vst.msk [vmem:[%s1012_s25 + $0x60] sm:$0xff] %vm643_vm1, %v634_v3 }
 0x258   : > { %v635_v4 = vpop.f32.mrf.mxu3 }
 0x259   : > { %v636_v5 = vadd.f32 %v809_v39, %v635_v4 }
 0x25b   : > { %657 = vst.msk [vmem:[%s1012_s25 + $0x68] sm:$0xff] %vm643_vm1, %v636_v5 }
 0x260   : > { %v638_v6 = vpop.f32.mrf.mxu3 }
 0x261   : > { %v639_v7 = vadd.f32 %v809_v39, %v638_v6 }
 0x263   : > { %658 = vst.msk [vmem:[%s1012_s25 + $0x70] sm:$0xff] %vm643_vm1, %v639_v7 }
 0x268   : > { %v640_v8 = vpop.f32.mrf.mxu3 }
 0x269   : > { %v641_v9 = vadd.f32 %v809_v39, %v640_v8 }
 0x26b   : > { %659 = vst.msk [vmem:[%s1012_s25 + $0x78] sm:$0xff] %vm643_vm1, %v641_v9 }
 0x26c PF: > { %s15_s18 = sadd.s32 1, %s816_s18  }
 0x26d   : > { %p12_p5 = scmp.ge.s32.totalorder %s15_s18, 4  }
 0x26f   :  { %14 = sbr.rel (!%p12_p5) target bundleno = 1 (0x1), region = 70 }

</bundles_post_ra>
